<compile_context>
chip_gen: v5e
topology: v5e:2x2
jax: 0.10.0
libtpu: 0.0.40
codegen_flags: <defaults>
</compile_context>

<pallas_src>
import functools

import jax
import jax.numpy as jnp
from jax import lax
from jax.experimental import pallas as pl
from jax.experimental.pallas import tpu as pltpu

_LANES = 128  # lane width: hidden (last-dim) width padded to this


def _round_up(n, m):
    return ((n + m - 1) // m) * m


def _elu(x):
    # ELU(alpha=1): x if x>0 else exp(x)-1.  exp sits on the EUP slot (otherwise idle);
    # min() clamps the not-taken branch so it cannot overflow.  The expm1-cancellation
    # error (~1e-7 abs) is far below matmul noise, so no Taylor patch.
    return jnp.where(x > 0, x, jnp.exp(jnp.minimum(x, 0.0)) - 1.0)


def _joint_mlp_kernel(num_layers, act_dtype, unroll_hidden,
                      xg_ref, w_in_ref, b_in_ref,
                      w_hid_ref, b_hid_ref,
                      w_out_ref, b_out_ref,
                      o_ref):
    f32 = jnp.float32
    mm_dtype = w_in_ref.dtype

    # ---- input layer: gamma is already folded into the K dim (wrapper concat) ----
    acc = jnp.dot(xg_ref[...], w_in_ref[...], preferred_element_type=f32)
    h = _elu(acc.astype(act_dtype) + b_in_ref[...])       # bias + ELU in act_dtype

    # ---- hidden layers -----------------------------------------------------------
    def layer(i, h):
        z = jnp.dot(h.astype(mm_dtype), w_hid_ref[i], preferred_element_type=f32)
        return _elu(z.astype(act_dtype) + b_hid_ref[pl.ds(i, 1), :])

    if unroll_hidden:
        for i in range(num_layers):       # small L: static unroll (LLO sees everything)
            h = layer(i, h)
    else:
        # large L: bounded live ranges + dynamic weight index avoids vreg spill
        h = lax.fori_loop(0, num_layers, layer, h)

    # ---- output layer (no activation); stored unpadded (tiny out_dim) ------------
    out = (jnp.dot(h.astype(mm_dtype), w_out_ref[...], preferred_element_type=f32)
           + b_out_ref[...])
    o_ref[...] = out.astype(o_ref.dtype)


def pack_params(params, *, num_layers, matmul_dtype=jnp.bfloat16, act_dtype=None):
    """One-time weight packing: pad hidden width to 128 lanes, cast to target dtypes.

    Zero padding is exact (ELU(0)=0, zero weight rows/cols contribute nothing).
    matmul_dtype=bf16 is the fast path on ALL generations (v5e's MXU is a native bf16
    unit too); act_dtype controls the bias+ELU VPU/EUP math (bf16 on v6e/v7x, pass
    jnp.float32 on v5e or for tighter numerics).
    """
    w_in, b_in, w_hid, b_hid, w_out, b_out = params
    if act_dtype is None:
        act_dtype = matmul_dtype
    in_dim, H = w_in.shape
    out_dim = w_out.shape[1]
    Hp = _round_up(H, _LANES)
    Lp = max(num_layers, 1)

    w_in_p = jnp.zeros((in_dim, Hp), matmul_dtype).at[:, :H].set(w_in.astype(matmul_dtype))
    b_in_p = jnp.zeros((1, Hp), act_dtype).at[0, :H].set(b_in.reshape(-1).astype(act_dtype))

    w_hid_p = jnp.zeros((Lp, Hp, Hp), matmul_dtype)
    b_hid_p = jnp.zeros((Lp, Hp), act_dtype)
    if num_layers > 0:
        w_hid_p = w_hid_p.at[:num_layers, :H, :H].set(w_hid.astype(matmul_dtype))
        b_hid_p = b_hid_p.at[:num_layers, :H].set(b_hid.astype(act_dtype))

    w_out_p = jnp.zeros((Hp, out_dim), matmul_dtype).at[:H, :].set(w_out.astype(matmul_dtype))
    b_out_p = jnp.zeros((1, out_dim), jnp.float32).at[0, :].set(
        b_out.reshape(-1).astype(jnp.float32))

    return {
        "num_layers": num_layers, "in_dim": in_dim, "hidden_padded": Hp,
        "out_dim": out_dim, "matmul_dtype": jnp.dtype(matmul_dtype),
        "act_dtype": jnp.dtype(act_dtype),
        "w_in": w_in_p, "b_in": b_in_p, "w_hid": w_hid_p, "b_hid": b_hid_p,
        "w_out": w_out_p, "b_out": b_out_p,
    }


def _pick_batch_tile(B, max_rows=2048):
    """Prefer few, EVEN grid steps: weights are resident (nothing worth pipelining),
    each grid step costs ~0.35us fixed overhead, and an even step count splits
    cleanly across v7x's two TensorCores."""
    if B <= max_rows:
        if B >= 16 and B % 16 == 0:
            return B // 2                 # 2 steps, each a multiple of 8 rows
        return B                          # single full-array tile
    for steps in (2, 4, 8, 16, 32, 64, 128):
        if B % steps == 0:
            tb = B // steps
            if tb <= max_rows and tb % 8 == 0:
                return tb
    return B


def _resident_spec(shape):
    """Constant-index-map block, single-buffered (loaded once, resident across the grid)."""
    zeros = (0,) * len(shape)
    return pl.BlockSpec(shape, lambda i: zeros, pipeline_mode=pl.Buffered(1))


def joint_mlp_forward(x, gamma, packed, *, batch_tile=None):
    """JointMLP forward. x: [B, x_dim], gamma: [B, g_dim]; packed from pack_params().
    Returns logits [B, out_dim] in float32."""
    B, x_dim = x.shape
    g_dim = gamma.shape[1]
    in_dim = packed["in_dim"]
    assert x_dim + g_dim == in_dim
    Hp = packed["hidden_padded"]
    out_dim = packed["out_dim"]
    num_layers = packed["num_layers"]
    mm_dtype = packed["matmul_dtype"]
    act_dtype = packed["act_dtype"]
    Lp = packed["w_hid"].shape[0]
    f32 = jnp.float32

    # Fuse the concat here (8-wide, a few KB of HBM traffic) and cast to the matmul
    # dtype once -> one lane-narrow input stream instead of two, half the DMA bytes.
    xg = jnp.concatenate([x, gamma], axis=-1).astype(mm_dtype)

    tb = batch_tile if batch_tile is not None else _pick_batch_tile(B)
    assert B % tb == 0, "batch must be divisible by batch_tile"
    grid = (B // tb,)

    # Advisory cost estimate for the XLA scheduler.
    flops = 2 * B * (in_dim * Hp + num_layers * Hp * Hp + Hp * out_dim)
    transcendentals = B * Hp * (num_layers + 1)             # exp in ELU
    weight_bytes = sum(packed[k].size * packed[k].dtype.itemsize
                       for k in ("w_in", "b_in", "w_hid", "b_hid", "w_out", "b_out"))
    bytes_accessed = (xg.size * xg.dtype.itemsize + weight_bytes + B * out_dim * 4)
    cost = pl.CostEstimate(flops=int(flops), transcendentals=int(transcendentals),
                           bytes_accessed=int(bytes_accessed))

    # VMEM budget from actual buffer sizes: single-buffered resident weights +
    # double-buffered streamed input/output tiles + headroom.
    io_bytes = 2 * tb * (in_dim * jnp.dtype(mm_dtype).itemsize + out_dim * 4)
    vmem_limit = int(min(max(int(1.5 * weight_bytes) + 2 * io_bytes + (2 << 20), 8 << 20),
                         100 << 20))
    # TODO(synk): cap at ~56 MiB / stream one hidden layer at a time via make_async_copy
    # when L*Hp*Hp weights approach v7x's 64 MiB physical VMEM.

    unroll_hidden = num_layers <= 8
    kernel = functools.partial(_joint_mlp_kernel, num_layers, act_dtype, unroll_hidden)

    out = pl.pallas_call(
        kernel,
        out_shape=jax.ShapeDtypeStruct((B, out_dim), jnp.float32),
        grid_spec=pltpu.PrefetchScalarGridSpec(
            num_scalar_prefetch=0,
            grid=grid,
            in_specs=[
                pl.BlockSpec((tb, in_dim), lambda i: (i, 0)),   # fused [x|gamma] (streamed)
                _resident_spec((in_dim, Hp)),                   # W_in
                _resident_spec((1, Hp)),                        # b_in
                _resident_spec((Lp, Hp, Hp)),                   # stacked hidden W
                _resident_spec((Lp, Hp)),                       # stacked hidden b
                _resident_spec((Hp, out_dim)),                  # W_out
                _resident_spec((1, out_dim)),                   # b_out
            ],
            out_specs=pl.BlockSpec((tb, out_dim), lambda i: (i, 0)),  # unpadded store
        ),
        compiler_params=pltpu.CompilerParams(
            dimension_semantics=("parallel",),
            vmem_limit_bytes=vmem_limit,
        ),
        cost_estimate=cost,
    )(xg, packed["w_in"], packed["b_in"], packed["w_hid"], packed["b_hid"],
      packed["w_out"], packed["b_out"])
    return out


def init_params(key, input_dim, output_dim, hidden, num_layers):
    """PyTorch-Linear-like uniform init; weights stored as [in, out]."""
    ks = jax.random.split(key, 6)

    def unif(k, shape, fan_in):
        bound = 1.0 / jnp.sqrt(fan_in)
        return jax.random.uniform(k, shape, jnp.float32, -bound, bound)

    w_in = unif(ks[0], (input_dim, hidden), input_dim)
    b_in = unif(ks[1], (hidden,), input_dim)
    w_hid = unif(ks[2], (num_layers, hidden, hidden), hidden)
    b_hid = unif(ks[3], (num_layers, hidden), hidden)
    w_out = unif(ks[4], (hidden, output_dim), hidden)
    b_out = unif(ks[5], (output_dim,), hidden)
    return (w_in, b_in, w_hid, b_hid, w_out, b_out)


def reference_forward(x, gamma, params, num_layers):
    """Plain-JAX reference using true expm1 ELU (matches torch.nn.ELU)."""
    w_in, b_in, w_hid, b_hid, w_out, b_out = params

    def elu(v):
        return jnp.where(v > 0, v, jnp.expm1(v))

    h = jnp.concatenate([x, gamma], axis=-1)
    h = elu(h @ w_in + b_in[None, :])
    for i in range(num_layers):
        h = elu(h @ w_hid[i] + b_hid[i][None, :])
    return h @ w_out + b_out[None, :]


if __name__ == "__main__":
    # Shapes consistent with the module's forward:
    #   x: [batch, x_dim], gamma: [batch, gamma_dim], input_dim = x_dim + gamma_dim.
    batch, x_dim, gamma_dim = 256, 7, 1
    input_dim = x_dim + gamma_dim
    hidden, num_layers, output_dim = 32, 2, 1

    key = jax.random.PRNGKey(0)
    kx, kg, kp = jax.random.split(key, 3)
    x = jax.random.normal(kx, (batch, x_dim), jnp.float32)
    gamma = jax.random.uniform(kg, (batch, gamma_dim), jnp.float32)
    params = init_params(kp, input_dim, output_dim, hidden, num_layers)

    ref = reference_forward(x, gamma, params, num_layers)

    # f32 matmul + f32 VPU path: tight correctness check vs the plain-JAX reference.
    packed_f32 = pack_params(params, num_layers=num_layers,
                             matmul_dtype=jnp.float32, act_dtype=jnp.float32)
    out_f32 = jax.block_until_ready(joint_mlp_forward(x, gamma, packed_f32))
    assert out_f32.shape == (batch, output_dim)
    assert jnp.allclose(out_f32, ref, atol=1e-4, rtol=1e-4), "f32 kernel mismatch"

    # bf16 fast path (default on all generations): pack once, reuse per call.
    # h stays bf16 between layers, so rounding compounds with depth -> loose tolerance.
    packed_bf16 = pack_params(params, num_layers=num_layers)
    out_bf16 = jax.block_until_ready(joint_mlp_forward(x, gamma, packed_bf16))
    assert out_bf16.shape == (batch, output_dim)
    assert jnp.allclose(out_bf16, ref, atol=1e-1, rtol=1e-1), "bf16 kernel mismatch"

    print("KERNEL_OK")
</pallas_src>

<mosaic_0001>
module attributes {stable_mosaic.version = 11 : i64} {
  func.func @_joint_mlp_kernel(%arg0: i32, %arg1: memref<128x8xf32, #tpu.memory_space<vmem>>, %arg2: memref<8x128xf32, #tpu.memory_space<vmem>>, %arg3: memref<1x128xf32, #tpu.memory_space<vmem>>, %arg4: memref<2x128x128xf32, #tpu.memory_space<vmem>>, %arg5: memref<2x128xf32, #tpu.memory_space<vmem>>, %arg6: memref<128x1xf32, #tpu.memory_space<vmem>>, %arg7: memref<1x1xf32, #tpu.memory_space<vmem>>, %arg8: memref<128x1xf32, #tpu.memory_space<vmem>>) attributes {dimension_semantics = [#tpu.dimension_semantics<parallel>], iteration_bounds = array<i64: 2>, scalar_prefetch = 0 : i64, scratch_operands = 0 : i64, tpu.core_type = #tpu.core_type<tc>, window_params = [{transform_indices = @transform_0, window_bounds = array<i64: 128, 8>}, {pipeline_mode = #tpu.pipeline_mode<synchronous>, transform_indices = @transform_1, window_bounds = array<i64: 8, 128>}, {pipeline_mode = #tpu.pipeline_mode<synchronous>, transform_indices = @transform_2, window_bounds = array<i64: 1, 128>}, {pipeline_mode = #tpu.pipeline_mode<synchronous>, transform_indices = @transform_3, window_bounds = array<i64: 2, 128, 128>}, {pipeline_mode = #tpu.pipeline_mode<synchronous>, transform_indices = @transform_4, window_bounds = array<i64: 2, 128>}, {pipeline_mode = #tpu.pipeline_mode<synchronous>, transform_indices = @transform_5, window_bounds = array<i64: 128, 1>}, {pipeline_mode = #tpu.pipeline_mode<synchronous>, transform_indices = @transform_6, window_bounds = array<i64: 1, 1>}, {transform_indices = @transform_7, window_bounds = array<i64: 128, 1>}]} {
    %c0 = arith.constant 0 : index
    %c0_0 = arith.constant 0 : index
    %0 = vector.load %arg1[%c0, %c0_0] : memref<128x8xf32, #tpu.memory_space<vmem>>, vector<128x8xf32>
    %c0_1 = arith.constant 0 : index
    %c0_2 = arith.constant 0 : index
    %1 = vector.load %arg2[%c0_1, %c0_2] : memref<8x128xf32, #tpu.memory_space<vmem>>, vector<8x128xf32>
    %cst = arith.constant dense<0.000000e+00> : vector<128x128xf32>
    %2 = tpu.matmul %0, %1, %cst {dimension_numbers = #tpu.dot_dimension_numbers<[1], [0], [0], [1], [0, 0, 1, 1], [], []>} : vector<128x8xf32>, vector<8x128xf32>, vector<128x128xf32> -> vector<128x128xf32>
    %c0_3 = arith.constant 0 : index
    %c0_4 = arith.constant 0 : index
    %3 = vector.load %arg3[%c0_3, %c0_4] : memref<1x128xf32, #tpu.memory_space<vmem>>, vector<1x128xf32>
    %4 = vector.broadcast %3 : vector<1x128xf32> to vector<128x128xf32>
    %5 = arith.addf %2, %4 : vector<128x128xf32>
    %cst_5 = arith.constant 0.000000e+00 : f32
    %6 = vector.broadcast %cst_5 : f32 to vector<128x128xf32>
    %7 = arith.cmpf ogt, %5, %6 : vector<128x128xf32>
    %cst_6 = arith.constant 0.000000e+00 : f32
    %8 = vector.broadcast %cst_6 : f32 to vector<128x128xf32>
    %9 = arith.minimumf %5, %8 : vector<128x128xf32>
    %10 = math.exp %9 : vector<128x128xf32>
    %cst_7 = arith.constant 1.000000e+00 : f32
    %11 = vector.broadcast %cst_7 : f32 to vector<128x128xf32>
    %12 = arith.subf %10, %11 : vector<128x128xf32>
    %13 = arith.select %7, %5, %12 : vector<128x128xi1>, vector<128x128xf32>
    %c0_8 = arith.constant 0 : index
    %c0_9 = arith.constant 0 : index
    %c0_10 = arith.constant 0 : index
    %14 = vector.load %arg4[%c0_8, %c0_9, %c0_10] : memref<2x128x128xf32, #tpu.memory_space<vmem>>, vector<1x128x128xf32>
    %15 = vector.shape_cast %14 : vector<1x128x128xf32> to vector<128x128xf32>
    %cst_11 = arith.constant dense<0.000000e+00> : vector<128x128xf32>
    %16 = tpu.matmul %13, %15, %cst_11 {dimension_numbers = #tpu.dot_dimension_numbers<[1], [0], [0], [1], [0, 0, 1, 1], [], []>} : vector<128x128xf32>, vector<128x128xf32>, vector<128x128xf32> -> vector<128x128xf32>
    %c0_12 = arith.constant 0 : index
    %c0_13 = arith.constant 0 : index
    %17 = vector.load %arg5[%c0_12, %c0_13] : memref<2x128xf32, #tpu.memory_space<vmem>>, vector<1x128xf32>
    %18 = vector.broadcast %17 : vector<1x128xf32> to vector<128x128xf32>
    %19 = arith.addf %16, %18 : vector<128x128xf32>
    %cst_14 = arith.constant 0.000000e+00 : f32
    %20 = vector.broadcast %cst_14 : f32 to vector<128x128xf32>
    %21 = arith.cmpf ogt, %19, %20 : vector<128x128xf32>
    %cst_15 = arith.constant 0.000000e+00 : f32
    %22 = vector.broadcast %cst_15 : f32 to vector<128x128xf32>
    %23 = arith.minimumf %19, %22 : vector<128x128xf32>
    %24 = math.exp %23 : vector<128x128xf32>
    %cst_16 = arith.constant 1.000000e+00 : f32
    %25 = vector.broadcast %cst_16 : f32 to vector<128x128xf32>
    %26 = arith.subf %24, %25 : vector<128x128xf32>
    %27 = arith.select %21, %19, %26 : vector<128x128xi1>, vector<128x128xf32>
    %c1 = arith.constant 1 : index
    %c0_17 = arith.constant 0 : index
    %c0_18 = arith.constant 0 : index
    %28 = vector.load %arg4[%c1, %c0_17, %c0_18] : memref<2x128x128xf32, #tpu.memory_space<vmem>>, vector<1x128x128xf32>
    %29 = vector.shape_cast %28 : vector<1x128x128xf32> to vector<128x128xf32>
    %cst_19 = arith.constant dense<0.000000e+00> : vector<128x128xf32>
    %30 = tpu.matmul %27, %29, %cst_19 {dimension_numbers = #tpu.dot_dimension_numbers<[1], [0], [0], [1], [0, 0, 1, 1], [], []>} : vector<128x128xf32>, vector<128x128xf32>, vector<128x128xf32> -> vector<128x128xf32>
    %c1_20 = arith.constant 1 : index
    %c0_21 = arith.constant 0 : index
    %31 = vector.load %arg5[%c1_20, %c0_21] : memref<2x128xf32, #tpu.memory_space<vmem>>, vector<1x128xf32>
    %32 = vector.broadcast %31 : vector<1x128xf32> to vector<128x128xf32>
    %33 = arith.addf %30, %32 : vector<128x128xf32>
    %cst_22 = arith.constant 0.000000e+00 : f32
    %34 = vector.broadcast %cst_22 : f32 to vector<128x128xf32>
    %35 = arith.cmpf ogt, %33, %34 : vector<128x128xf32>
    %cst_23 = arith.constant 0.000000e+00 : f32
    %36 = vector.broadcast %cst_23 : f32 to vector<128x128xf32>
    %37 = arith.minimumf %33, %36 : vector<128x128xf32>
    %38 = math.exp %37 : vector<128x128xf32>
    %cst_24 = arith.constant 1.000000e+00 : f32
    %39 = vector.broadcast %cst_24 : f32 to vector<128x128xf32>
    %40 = arith.subf %38, %39 : vector<128x128xf32>
    %41 = arith.select %35, %33, %40 : vector<128x128xi1>, vector<128x128xf32>
    %c0_25 = arith.constant 0 : index
    %c0_26 = arith.constant 0 : index
    %42 = vector.load %arg6[%c0_25, %c0_26] : memref<128x1xf32, #tpu.memory_space<vmem>>, vector<128x1xf32>
    %cst_27 = arith.constant dense<0.000000e+00> : vector<128x1xf32>
    %43 = tpu.matmul %41, %42, %cst_27 {dimension_numbers = #tpu.dot_dimension_numbers<[1], [0], [0], [1], [0, 0, 1, 1], [], []>} : vector<128x128xf32>, vector<128x1xf32>, vector<128x1xf32> -> vector<128x1xf32>
    %c0_28 = arith.constant 0 : index
    %c0_29 = arith.constant 0 : index
    %44 = vector.load %arg7[%c0_28, %c0_29] : memref<1x1xf32, #tpu.memory_space<vmem>>, vector<1x1xf32>
    %45 = vector.broadcast %44 : vector<1x1xf32> to vector<128x1xf32>
    %46 = arith.addf %43, %45 : vector<128x1xf32>
    %c0_30 = arith.constant 0 : index
    %c0_31 = arith.constant 0 : index
    %47 = vector.load %arg8[%c0_30, %c0_31] : memref<128x1xf32, #tpu.memory_space<vmem>>, vector<128x1xf32>
    tpu.vector_store %arg8[%c0_30, %c0_31], %46 {strides = array<i32>} : memref<128x1xf32, #tpu.memory_space<vmem>>, vector<128x1xf32>,
    return
  }
  func.func @transform_0(%arg0: i32) -> (i32, i32) {
    %c0_i32 = arith.constant 0 : i32
    %c0_i32_0 = arith.constant 0 : i32
    return %arg0, %c0_i32 : i32, i32
  }
  func.func @transform_1(%arg0: i32) -> (i32, i32) {
    %c0_i32 = arith.constant 0 : i32
    %c0_i32_0 = arith.constant 0 : i32
    %c0_i32_1 = arith.constant 0 : i32
    return %c0_i32, %c0_i32_0 : i32, i32
  }
  func.func @transform_2(%arg0: i32) -> (i32, i32) {
    %c0_i32 = arith.constant 0 : i32
    %c0_i32_0 = arith.constant 0 : i32
    %c0_i32_1 = arith.constant 0 : i32
    return %c0_i32, %c0_i32_0 : i32, i32
  }
  func.func @transform_3(%arg0: i32) -> (i32, i32, i32) {
    %c0_i32 = arith.constant 0 : i32
    %c0_i32_0 = arith.constant 0 : i32
    %c0_i32_1 = arith.constant 0 : i32
    %c0_i32_2 = arith.constant 0 : i32
    return %c0_i32, %c0_i32_0, %c0_i32_1 : i32, i32, i32
  }
  func.func @transform_4(%arg0: i32) -> (i32, i32) {
    %c0_i32 = arith.constant 0 : i32
    %c0_i32_0 = arith.constant 0 : i32
    %c0_i32_1 = arith.constant 0 : i32
    return %c0_i32, %c0_i32_0 : i32, i32
  }
  func.func @transform_5(%arg0: i32) -> (i32, i32) {
    %c0_i32 = arith.constant 0 : i32
    %c0_i32_0 = arith.constant 0 : i32
    %c0_i32_1 = arith.constant 0 : i32
    return %c0_i32, %c0_i32_0 : i32, i32
  }
  func.func @transform_6(%arg0: i32) -> (i32, i32) {
    %c0_i32 = arith.constant 0 : i32
    %c0_i32_0 = arith.constant 0 : i32
    %c0_i32_1 = arith.constant 0 : i32
    return %c0_i32, %c0_i32_0 : i32, i32
  }
  func.func @transform_7(%arg0: i32) -> (i32, i32) {
    %c0_i32 = arith.constant 0 : i32
    %c0_i32_0 = arith.constant 0 : i32
    return %arg0, %c0_i32 : i32, i32
  }
}

</mosaic_0001>

<bundles_post_ra>
// kernel: tpu_custom_call.1
= control target key start
LH: loop header
LB: loop body
LE: loop exit
PB: predicated region body
PF: predicated region fallthrough
CT: control target
= control target key end

     0   :  { %s1298_s26 = smov 0   ;;  %s1600_s0 = inlined_call_operand.vmem [shape: f32[256,8], index: 0, kind: input, shape index: {}]   ;;  %s1601_s1 = inlined_call_operand.vmem [shape: f32[8,128], index: 1, kind: input, shape index: {}]   ;;  %s1602_s2 = inlined_call_operand.vmem [shape: f32[1,128], index: 2, kind: input, shape index: {}]   ;;  %s1603_s3 = inlined_call_operand.vmem [shape: f32[2,128,128], index: 3, kind: input, shape index: {}]   ;;  %s1604_s4 = inlined_call_operand.vmem [shape: f32[2,128], index: 4, kind: input, shape index: {}]   ;;  %s1605_s5 = inlined_call_operand.vmem [shape: f32[128,1], index: 5, kind: input, shape index: {}]   ;;  %s1606_s6 = inlined_call_operand.<no memory space> [shape: f32[1,1], index: 6, kind: input, shape index: {}]   ;;  %s1607_s7 = inlined_call_operand.vmem [shape: f32[256,1], index: 7, kind: output, shape index: {}]  }
   0x1   :  { %v12_v0 = vstv %s1606_s6 }
   0x2   :  { %13 = vst [vmem:[#allocation2] sm:$0x1] %v12_v0 }
   0x3 LB: > { %s1032_s27 = sadd.s32 4294967295, %s1253_s26   ;;  %p1036_p0 = scmp.ge.s32.totalorder %s1253_s26, 1  ;;  %s1253_s26 = sphi %s1298_s26, %s19_s26  }
   0x4   : > { %p240_p1 = scmp.lt.s32.totalorder %s1253_s26, 3 }
   0x6   : > { %p241_p2 = pnand %p1036_p0, %p240_p1 }
   0x7   : > { %s1037_s6 = sshll.u32 (!%p241_p2), %s1032_s27, 4 }
   0x8   : > { %244 = sbr.rel (%p241_p2) target bundleno = 704 (0x2c0), region = 48  ;;  %p273_p3 = scmp.lt.s32.totalorder (!%p241_p2), %s1037_s6, 31 }
   0xd   : > { %v300_v1 = vld [vmem:[%s1601_s1] sm:$0xff]  ;;  %v530_v2 = vld [vmem:[%s1603_s3 + $0x78] sm:$0xff]  ;;  %v529_v3 = vld [vmem:[%s1603_s3 + $0x70] sm:$0xff]  ;;  %s1609_s6 = smov (!%p273_p3, %s1037_s6), 31  ;;  %vm305_vm0 = vcmask 64512  }
   0xe   : > { %369 = vmatpush.msra.mxu0 %v300_v1  ;;  %1123 = vmatpush.msra.mxu1 %v530_v2  ;;  %v528_v4 = vld [vmem:[%s1603_s3 + $0x68] sm:$0xff]  ;;  %s1038_s13 = sshll.u32 %s1609_s6, 3  ;;  %v527_v6 = vld [vmem:[%s1603_s3 + $0x60] sm:$0xff]  ;;  %v526_v8 = vld [vmem:[%s1603_s3 + $0x58] sm:$0xff] }
   0xf   : > { %s1326_s16 = scalar_lea.vmem %s1600_s0, %s1038_s13  ;;  %v525_v10 = vld [vmem:[%s1603_s3 + $0x50] sm:$0xff]  ;;  %v524_v12 = vld [vmem:[%s1603_s3 + $0x48] sm:$0xff]  ;;  %v523_v14 = vld [vmem:[%s1603_s3 + $0x40] sm:$0xff]  ;;  %s1563_s9 = scalar_lea.vmem %s1607_s7, %s1038_s13 }
  0x10   : > { %533 = vmatpush.msrb.mxu0 %v530_v2  ;;  %1124 = vmatpush.msra.mxu1 %v529_v3  ;;  %v284_v5 = vld [vmem:[%s1326_s16] sm:$0xff]  ;;  %v285_v7 = vld [vmem:[%s1326_s16 + $0x8] sm:$0xff]  ;;  %v286_v9 = vld [vmem:[%s1326_s16 + $0x10] sm:$0xff] }
  0x11   : > { %1041 = vmatmul.msk.f32.vlgmr.msra.gmra.mxu0 %vm305_vm0, %v284_v5  ;;  %v287_v11 = vld [vmem:[%s1326_s16 + $0x18] sm:$0xff]  ;;  %v288_v13 = vld [vmem:[%s1326_s16 + $0x20] sm:$0xff]  ;;  %v289_v15 = vld [vmem:[%s1326_s16 + $0x28] sm:$0xff] }
  0x12   : > { %534 = vmatpush.msrb.mxu0 %v529_v3  ;;  %1125 = vmatpush.msra.mxu1 %v528_v4  ;;  %v522_v16 = vld [vmem:[%s1603_s3 + $0x38] sm:$0xff]  ;;  %v290_v17 = vld [vmem:[%s1326_s16 + $0x30] sm:$0xff]  ;;  %v520_v20 = vld [vmem:[%s1603_s3 + $0x28] sm:$0xff] }
  0x13   : > { %v521_v18 = vld [vmem:[%s1603_s3 + $0x30] sm:$0xff]  ;;  %v291_v19 = vld [vmem:[%s1326_s16 + $0x38] sm:$0xff]  ;;  %v292_v21 = vld [vmem:[%s1326_s16 + $0x40] sm:$0xff] }
  0x14   : > { %535 = vmatpush.msrb.mxu0 %v528_v4  ;;  %1126 = vmatpush.msra.mxu1 %v527_v6  ;;  %v519_v22 = vld [vmem:[%s1603_s3 + $0x20] sm:$0xff]  ;;  %v293_v23 = vld [vmem:[%s1326_s16 + $0x48] sm:$0xff]  ;;  %v518_v24 = vld [vmem:[%s1603_s3 + $0x18] sm:$0xff] }
  0x15   : > { %v294_v25 = vld [vmem:[%s1326_s16 + $0x50] sm:$0xff]  ;;  %v295_v27 = vld [vmem:[%s1326_s16 + $0x58] sm:$0xff]  ;;  %v296_v28 = vld [vmem:[%s1326_s16 + $0x60] sm:$0xff] }
  0x16   : > { %536 = vmatpush.msrb.mxu0 %v527_v6  ;;  %1127 = vmatpush.msra.mxu1 %v526_v8  ;;  %v517_v26 = vld [vmem:[%s1603_s3 + $0x10] sm:$0xff]  ;;  %v516_v29 = vld [vmem:[%s1603_s3 + $0x8] sm:$0xff]  ;;  %v515_v31 = vld [vmem:[%s1603_s3] sm:$0xff] }
  0x17   : > { %v297_v30 = vld [vmem:[%s1326_s16 + $0x68] sm:$0xff]  ;;  %v298_v32 = vld [vmem:[%s1326_s16 + $0x70] sm:$0xff]  ;;  %v299_v33 = vld [vmem:[%s1326_s16 + $0x78] sm:$0xff] }
  0x18   : > { %537 = vmatpush.msrb.mxu0 %v526_v8  ;;  %1128 = vmatpush.msra.mxu1 %v525_v10  ;;  %v1402_v34 = vld [vmem:[%s1602_s2] ss:$0 sm:$0xff] }
  0x19   : > { %1042 = vmatmul.msk.f32.gmra.mxu0 %vm305_vm0, %v285_v7 }
  0x1a   : > { %538 = vmatpush.msrb.mxu0 %v525_v10  ;;  %1129 = vmatpush.msra.mxu1 %v524_v12 }
  0x1c   : > { %539 = vmatpush.msrb.mxu0 %v524_v12  ;;  %1130 = vmatpush.msra.mxu1 %v523_v14 }
  0x1e   : > { %540 = vmatpush.msrb.mxu0 %v523_v14  ;;  %1131 = vmatpush.msra.mxu1 %v522_v16 }
  0x20   : > { %541 = vmatpush.msrb.mxu0 %v522_v16  ;;  %1132 = vmatpush.msra.mxu1 %v521_v18 }
  0x21   : > { %1043 = vmatmul.msk.f32.gmra.mxu0 %vm305_vm0, %v286_v9 }
  0x22   : > { %542 = vmatpush.msrb.mxu0 %v521_v18  ;;  %1133 = vmatpush.msra.mxu1 %v520_v20 }
  0x24   : > { %543 = vmatpush.msrb.mxu0 %v520_v20  ;;  %1134 = vmatpush.msra.mxu1 %v519_v22 }
  0x26   : > { %544 = vmatpush.msrb.mxu0 %v519_v22  ;;  %1135 = vmatpush.msra.mxu1 %v518_v24 }
  0x28   : > { %545 = vmatpush.msrb.mxu0 %v518_v24  ;;  %1136 = vmatpush.msra.mxu1 %v517_v26 }
  0x29   : > { %1044 = vmatmul.msk.f32.gmra.mxu0 %vm305_vm0, %v287_v11 }
  0x2a   : > { %546 = vmatpush.msrb.mxu0 %v517_v26  ;;  %1137 = vmatpush.msra.mxu1 %v516_v29 }
  0x2c   : > { %547 = vmatpush.msrb.mxu0 %v516_v29  ;;  %1138 = vmatpush.msra.mxu1 %v515_v31 }
  0x2e   : > { %548 = vmatpush.msrb.mxu0 %v515_v31 }
  0x31   : > { %1045 = vmatmul.msk.f32.gmra.mxu0 %vm305_vm0, %v288_v13 }
  0x39   : > { %1046 = vmatmul.msk.f32.gmra.mxu0 %vm305_vm0, %v289_v15 }
  0x41   : > { %1047 = vmatmul.msk.f32.gmra.mxu0 %vm305_vm0, %v290_v17 }
  0x49   : > { %1048 = vmatmul.msk.f32.gmra.mxu0 %vm305_vm0, %v291_v19 }
  0x51   : > { %1049 = vmatmul.msk.f32.gmra.mxu0 %vm305_vm0, %v292_v21 }
  0x59   : > { %1050 = vmatmul.msk.f32.gmra.mxu0 %vm305_vm0, %v293_v23 }
  0x61   : > { %1051 = vmatmul.msk.f32.gmra.mxu0 %vm305_vm0, %v294_v25 }
  0x69   : > { %1052 = vmatmul.msk.f32.gmra.mxu0 %vm305_vm0, %v295_v27 }
  0x71   : > { %1053 = vmatmul.msk.f32.gmra.mxu0 %vm305_vm0, %v296_v28 }
  0x79   : > { %1054 = vmatmul.msk.f32.gmra.mxu0 %vm305_vm0, %v297_v30 }
  0x81   : > { %1055 = vmatmul.msk.f32.gmra.mxu0 %vm305_vm0, %v298_v32 }
  0x89   : > { %1056 = vmatmul.msk.f32.gmra.mxu0 %vm305_vm0, %v299_v33 }
  0x8e   : > { %v371_v35 = vpop.f32.mrf.mxu0 }
  0x8f   : > { %v372_v36 = vadd.f32 %v1402_v34, %v371_v35 }
  0x91   : > { %v435_v37 = vmin.f32 %v372_v36, 0.0  ;;  %vm419_vm1 = vcmp.gt.f32.partialorder %v372_v36, 0.0 }
  0x93   : > { %v451_v38 = vmul.f32 1.442695, %v435_v37 }
  0x95   : > { %1151 = vpow2.f32 %v451_v38 }
  0x96   : > { %v374_v39 = vpop.f32.mrf.mxu0 }
  0x97   : > { %v375_v40 = vadd.f32 %v1402_v34, %v374_v39 }
  0x99   : > { %v436_v41 = vmin.f32 %v375_v40, 0.0  ;;  %vm420_vm2 = vcmp.gt.f32.partialorder %v375_v40, 0.0 }
  0x9b   : > { %v1152_v42 = vpop.eup %1151  ;;  %v453_v43 = vmul.f32 1.442695, %v436_v41 }
  0x9c   : > { %v1057_v44 = vadd.f32 -1.0, %v1152_v42 }
  0x9d   : > { %1153 = vpow2.f32 %v453_v43 }
  0x9e   : > { %v377_v45 = vpop.f32.mrf.mxu0  ;;  %v499_v46 = vsel %vm419_vm1, %v372_v36, %v1057_v44 }
  0x9f   : > { %v378_v47 = vadd.f32 %v1402_v34, %v377_v45  ;;  %549 = vmatmul.f32.vlgmr.msrb.gmra.mxu0 %v499_v46 }
  0xa1   : > { %v437_v48 = vmin.f32 %v378_v47, 0.0  ;;  %vm421_vm3 = vcmp.gt.f32.partialorder %v378_v47, 0.0 }
  0xa3   : > { %v1154_v49 = vpop.eup %1153  ;;  %v455_v50 = vmul.f32 1.442695, %v437_v48 }
  0xa4   : > { %v1058_v51 = vadd.f32 -1.0, %v1154_v49 }
  0xa5   : > { %1155 = vpow2.f32 %v455_v50 }
  0xa6   : > { %v380_v52 = vpop.f32.mrf.mxu0  ;;  %v500_v53 = vsel %vm420_vm2, %v375_v40, %v1058_v51 }
  0xa7   : > { %v381_v54 = vadd.f32 %v1402_v34, %v380_v52  ;;  %552 = vmatmul.f32.vlgmr.msra.gmra.mxu1 %v500_v53  ;;  %v1104_v52 = vld [vmem:[%s1603_s3 + $0xf8] sm:$0xff] }
  0xa8   : > { %713 = vmatpush.msra.mxu2 %v1104_v52 }
  0xa9   : > { %v438_v55 = vmin.f32 %v381_v54, 0.0  ;;  %vm422_vm4 = vcmp.gt.f32.partialorder %v381_v54, 0.0 }
  0xab   : > { %v1156_v56 = vpop.eup %1155  ;;  %v457_v57 = vmul.f32 1.442695, %v438_v55 }
  0xac   : > { %v1059_v58 = vadd.f32 -1.0, %v1156_v56  ;;  %v1103_v56 = vld [vmem:[%s1603_s3 + $0xf0] sm:$0xff] }
  0xad   : > { %1157 = vpow2.f32 %v457_v57  ;;  %v1102_v57 = vld [vmem:[%s1603_s3 + $0xe8] sm:$0xff]  ;;  %714 = vmatpush.msra.mxu2 %v1103_v56 }
  0xae   : > { %v383_v59 = vpop.f32.mrf.mxu0  ;;  %v501_v60 = vsel %vm421_vm3, %v378_v47, %v1059_v58 }
  0xaf   : > { %v384_v61 = vadd.f32 %v1402_v34, %v383_v59  ;;  %555 = vmatmul.f32.gmra.mxu1 %v501_v60  ;;  %v1101_v59 = vld [vmem:[%s1603_s3 + $0xe0] sm:$0xff]  ;;  %715 = vmatpush.msra.mxu2 %v1102_v57 }
  0xb1   : > { %v439_v62 = vmin.f32 %v384_v61, 0.0  ;;  %vm423_vm5 = vcmp.gt.f32.partialorder %v384_v61, 0.0  ;;  %716 = vmatpush.msra.mxu2 %v1101_v59 }
  0xb3   : > { %v1158_v63 = vpop.eup %1157  ;;  %v459_v0 = vmul.f32 1.442695, %v439_v62  ;;  %v1100_v62 = vld [vmem:[%s1603_s3 + $0xd8] sm:$0xff] }
  0xb4   : > { %v1060_v1 = vadd.f32 -1.0, %v1158_v63  ;;  %717 = vmatpush.msra.mxu2 %v1100_v62 }
  0xb5   : > { %1159 = vpow2.f32 %v459_v0 }
  0xb6   : > { %v386_v2 = vpop.f32.mrf.mxu0  ;;  %v502_v3 = vsel %vm422_vm4, %v381_v54, %v1060_v1 }
  0xb7   : > { %v387_v4 = vadd.f32 %v1402_v34, %v386_v2  ;;  %558 = vmatmul.f32.gmra.mxu1 %v502_v3  ;;  %v1099_v3 = vld [vmem:[%s1603_s3 + $0xd0] sm:$0xff] }
  0xb8   : > { %718 = vmatpush.msra.mxu2 %v1099_v3 }
  0xb9   : > { %v440_v5 = vmin.f32 %v387_v4, 0.0  ;;  %vm424_vm6 = vcmp.gt.f32.partialorder %v387_v4, 0.0 }
  0xbb   : > { %v1160_v6 = vpop.eup %1159  ;;  %v461_v7 = vmul.f32 1.442695, %v440_v5 }
  0xbc   : > { %v1061_v8 = vadd.f32 -1.0, %v1160_v6 }
  0xbd   : > { %1161 = vpow2.f32 %v461_v7 }
  0xbe   : > { %v389_v9 = vpop.f32.mrf.mxu0  ;;  %v503_v10 = vsel %vm423_vm5, %v384_v61, %v1061_v8  ;;  %v1097_v8 = vld [vmem:[%s1603_s3 + $0xc0] sm:$0xff] }
  0xbf   : > { %v390_v11 = vadd.f32 %v1402_v34, %v389_v9  ;;  %561 = vmatmul.f32.gmra.mxu1 %v503_v10  ;;  %v1096_v10 = vld [vmem:[%s1603_s3 + $0xb8] sm:$0xff] }
  0xc1   : > { %v441_v12 = vmin.f32 %v390_v11, 0.0  ;;  %vm425_vm7 = vcmp.gt.f32.partialorder %v390_v11, 0.0 }
  0xc3   : > { %v1162_v13 = vpop.eup %1161  ;;  %v463_v14 = vmul.f32 1.442695, %v441_v12 }
  0xc4   : > { %v1062_v15 = vadd.f32 -1.0, %v1162_v13 }
  0xc5   : > { %1163 = vpow2.f32 %v463_v14  ;;  %v1095_v14 = vld [vmem:[%s1603_s3 + $0xb0] sm:$0xff] }
  0xc6   : > { %v392_v16 = vpop.f32.mrf.mxu0  ;;  %v504_v17 = vsel %vm424_vm6, %v387_v4, %v1062_v15  ;;  %v1098_v4 = vld [vmem:[%s1603_s3 + $0xc8] sm:$0xff] }
  0xc7   : > { %v393_v18 = vadd.f32 %v1402_v34, %v392_v16  ;;  %564 = vmatmul.f32.gmra.mxu1 %v504_v17  ;;  %719 = vmatpush.msra.mxu2 %v1098_v4  ;;  %v1094_v16 = vld [vmem:[%s1603_s3 + $0xa8] sm:$0xff] }
  0xc9   : > { %v442_v19 = vmin.f32 %v393_v18, 0.0  ;;  %vm426_vm8 = vcmp.gt.f32.partialorder %v393_v18, 0.0  ;;  %720 = vmatpush.msra.mxu2 %v1097_v8 }
  0xcb   : > { %v1164_v20 = vpop.eup %1163  ;;  %v465_v21 = vmul.f32 1.442695, %v442_v19  ;;  %721 = vmatpush.msra.mxu2 %v1096_v10  ;;  %v1093_v19 = vld [vmem:[%s1603_s3 + $0xa0] sm:$0xff] }
  0xcc   : > { %v1063_v22 = vadd.f32 -1.0, %v1164_v20 }
  0xcd   : > { %1165 = vpow2.f32 %v465_v21  ;;  %722 = vmatpush.msra.mxu2 %v1095_v14  ;;  %v1092_v21 = vld [vmem:[%s1603_s3 + $0x98] sm:$0xff] }
  0xce   : > { %v395_v23 = vpop.f32.mrf.mxu0  ;;  %v505_v24 = vsel %vm425_vm7, %v390_v11, %v1063_v22 }
  0xcf   : > { %v396_v25 = vadd.f32 %v1402_v34, %v395_v23  ;;  %567 = vmatmul.f32.gmra.mxu1 %v505_v24  ;;  %723 = vmatpush.msra.mxu2 %v1094_v16 }
  0xd1   : > { %v443_v26 = vmin.f32 %v396_v25, 0.0  ;;  %vm427_vm9 = vcmp.gt.f32.partialorder %v396_v25, 0.0  ;;  %724 = vmatpush.msra.mxu2 %v1093_v19 }
  0xd3   : > { %v1166_v27 = vpop.eup %1165  ;;  %v467_v28 = vmul.f32 1.442695, %v443_v26  ;;  %725 = vmatpush.msra.mxu2 %v1092_v21 }
  0xd4   : > { %v1064_v29 = vadd.f32 -1.0, %v1166_v27  ;;  %v1090_v27 = vld [vmem:[%s1603_s3 + $0x88] sm:$0xff] }
  0xd5   : > { %1167 = vpow2.f32 %v467_v28 }
  0xd6   : > { %v398_v30 = vpop.f32.mrf.mxu0  ;;  %v506_v31 = vsel %vm426_vm8, %v393_v18, %v1064_v29 }
  0xd7   : > { %v399_v32 = vadd.f32 %v1402_v34, %v398_v30  ;;  %570 = vmatmul.f32.gmra.mxu1 %v506_v31  ;;  %v1089_v30 = vld [vmem:[%s1603_s3 + $0x80] sm:$0xff] }
  0xd9   : > { %v444_v33 = vmin.f32 %v399_v32, 0.0  ;;  %vm428_vm10 = vcmp.gt.f32.partialorder %v399_v32, 0.0 }
  0xdb   : > { %v1168_v35 = vpop.eup %1167  ;;  %v469_v36 = vmul.f32 1.442695, %v444_v33 }
  0xdc   : > { %v1065_v37 = vadd.f32 -1.0, %v1168_v35 }
  0xdd   : > { %1169 = vpow2.f32 %v469_v36  ;;  %v1471_v36 = vld [vmem:[%s1604_s4] ss:$0 sm:$0xff] }
  0xde   : > { %v401_v38 = vpop.f32.mrf.mxu0  ;;  %v507_v39 = vsel %vm427_vm9, %v396_v25, %v1065_v37  ;;  %v1091_v25 = vld [vmem:[%s1603_s3 + $0x90] sm:$0xff] }
  0xdf   : > { %v402_v40 = vadd.f32 %v1402_v34, %v401_v38  ;;  %573 = vmatmul.f32.gmra.mxu1 %v507_v39  ;;  %726 = vmatpush.msra.mxu2 %v1091_v25 }
  0xe1   : > { %v445_v41 = vmin.f32 %v402_v40, 0.0  ;;  %vm429_vm11 = vcmp.gt.f32.partialorder %v402_v40, 0.0  ;;  %727 = vmatpush.msra.mxu2 %v1090_v27 }
  0xe3   : > { %v1170_v42 = vpop.eup %1169  ;;  %v471_v43 = vmul.f32 1.442695, %v445_v41  ;;  %728 = vmatpush.msra.mxu2 %v1089_v30 }
  0xe4   : > { %v1066_v44 = vadd.f32 -1.0, %v1170_v42 }
  0xe5   : > { %1171 = vpow2.f32 %v471_v43 }
  0xe6   : > { %v404_v45 = vpop.f32.mrf.mxu0  ;;  %v508_v46 = vsel %vm428_vm10, %v399_v32, %v1066_v44 }
  0xe7   : > { %v405_v47 = vadd.f32 %v1402_v34, %v404_v45  ;;  %576 = vmatmul.f32.gmra.mxu1 %v508_v46 }
  0xe9   : > { %v446_v48 = vmin.f32 %v405_v47, 0.0  ;;  %vm430_vm12 = vcmp.gt.f32.partialorder %v405_v47, 0.0 }
  0xeb   : > { %v1172_v49 = vpop.eup %1171  ;;  %v473_v50 = vmul.f32 1.442695, %v446_v48 }
  0xec   : > { %v1067_v51 = vadd.f32 -1.0, %v1172_v49 }
  0xed   : > { %1173 = vpow2.f32 %v473_v50 }
  0xee   : > { %v407_v53 = vpop.f32.mrf.mxu0  ;;  %v509_v54 = vsel %vm429_vm11, %v402_v40, %v1067_v51 }
  0xef   : > { %v408_v55 = vadd.f32 %v1402_v34, %v407_v53  ;;  %579 = vmatmul.f32.gmra.mxu1 %v509_v54 }
  0xf1   : > { %v447_v58 = vmin.f32 %v408_v55, 0.0  ;;  %vm431_vm13 = vcmp.gt.f32.partialorder %v408_v55, 0.0 }
  0xf3   : > { %v1174_v60 = vpop.eup %1173  ;;  %v475_v61 = vmul.f32 1.442695, %v447_v58 }
  0xf4   : > { %v1068_v63 = vadd.f32 -1.0, %v1174_v60 }
  0xf5   : > { %1175 = vpow2.f32 %v475_v61 }
  0xf6   : > { %v410_v0 = vpop.f32.mrf.mxu0  ;;  %v510_v1 = vsel %vm430_vm12, %v405_v47, %v1068_v63 }
  0xf7   : > { %v411_v2 = vadd.f32 %v1402_v34, %v410_v0  ;;  %582 = vmatmul.f32.gmra.mxu1 %v510_v1 }
  0xf9   : > { %v448_v5 = vmin.f32 %v411_v2, 0.0  ;;  %vm432_vm14 = vcmp.gt.f32.partialorder %v411_v2, 0.0 }
  0xfb   : > { %v1176_v6 = vpop.eup %1175  ;;  %v477_v7 = vmul.f32 1.442695, %v448_v5 }
  0xfc   : > { %v1069_v9 = vadd.f32 -1.0, %v1176_v6 }
  0xfd   : > { %1177 = vpow2.f32 %v477_v7 }
  0xfe   : > { %v413_v11 = vpop.f32.mrf.mxu0  ;;  %v511_v12 = vsel %vm431_vm13, %v408_v55, %v1069_v9 }
  0xff   : > { %v414_v13 = vadd.f32 %v1402_v34, %v413_v11  ;;  %585 = vmatmul.f32.gmra.mxu1 %v511_v12 }
 0x101   : > { %v449_v15 = vmin.f32 %v414_v13, 0.0  ;;  %vm433_vm15 = vcmp.gt.f32.partialorder %v414_v13, 0.0 }
 0x103   : > { %v1178_v17 = vpop.eup %1177  ;;  %v479_v18 = vmul.f32 1.442695, %v449_v15 }
 0x104   : > { %v1070_v20 = vadd.f32 -1.0, %v1178_v17 }
 0x105   : > { %1179 = vpow2.f32 %v479_v18 }
 0x106   : > { %v416_v22 = vpop.f32.mrf.mxu0  ;;  %v512_v23 = vsel %vm432_vm14, %v411_v2, %v1070_v20 }
 0x107   : > { %v417_v24 = vadd.f32 %v1402_v34, %v416_v22  ;;  %588 = vmatmul.f32.gmra.mxu1 %v512_v23 }
 0x109   : > { %v450_v26 = vmin.f32 %v417_v24, 0.0  ;;  %vm434_vm0 = vcmp.gt.f32.partialorder %v417_v24, 0.0 }
 0x10b   : > { %v1180_v28 = vpop.eup %1179  ;;  %v481_v29 = vmul.f32 1.442695, %v450_v26 }
 0x10c   : > { %v1071_v31 = vadd.f32 -1.0, %v1180_v28 }
 0x10d   : > { %1181 = vpow2.f32 %v481_v29 }
 0x10e   : > { %v513_v34 = vsel %vm433_vm15, %v414_v13, %v1071_v31 }
 0x10f   : > { %591 = vmatmul.f32.gmra.mxu1 %v513_v34 }
 0x113   : > { %v1182_v32 = vpop.eup %1181 }
 0x114   : > { %v1072_v33 = vadd.f32 -1.0, %v1182_v32 }
 0x116   : > { %v514_v35 = vsel %vm434_vm0, %v417_v24, %v1072_v33 }
 0x117   : > { %594 = vmatmul.f32.gmra.mxu1 %v514_v35 }
 0x11c   : > { %v550_v37 = vpop.f32.mrf.mxu0 }
 0x11d   : > { %v551_v38 = vadd.f32 %v1471_v36, %v550_v37 }
 0x11f   : > { %v614_v39 = vmin.f32 %v551_v38, 0.0  ;;  %vm598_vm1 = vcmp.gt.f32.partialorder %v551_v38, 0.0 }
 0x121   : > { %v630_v40 = vmul.f32 1.442695, %v614_v39 }
 0x123   : > { %1183 = vpow2.f32 %v630_v40 }
 0x124   : > { %v553_v41 = vpop.f32.mrf.mxu1 }
 0x125   : > { %v554_v42 = vadd.f32 %v1471_v36, %v553_v41 }
 0x127   : > { %v615_v43 = vmin.f32 %v554_v42, 0.0  ;;  %vm599_vm2 = vcmp.gt.f32.partialorder %v554_v42, 0.0 }
 0x129   : > { %v1184_v44 = vpop.eup %1183  ;;  %v632_v45 = vmul.f32 1.442695, %v615_v43 }
 0x12a   : > { %v1073_v46 = vadd.f32 -1.0, %v1184_v44 }
 0x12b   : > { %1185 = vpow2.f32 %v632_v45 }
 0x12c   : > { %v556_v47 = vpop.f32.mrf.mxu1  ;;  %v678_v48 = vsel %vm598_vm1, %v551_v38, %v1073_v46 }
 0x12d   : > { %v557_v49 = vadd.f32 %v1471_v36, %v556_v47  ;;  %729 = vmatmul.f32.vlgmr.msra.gmra.mxu2 %v678_v48 }
 0x12f   : > { %v616_v50 = vmin.f32 %v557_v49, 0.0  ;;  %vm600_vm3 = vcmp.gt.f32.partialorder %v557_v49, 0.0 }
 0x131   : > { %v1186_v51 = vpop.eup %1185  ;;  %v634_v52 = vmul.f32 1.442695, %v616_v50 }
 0x132   : > { %v1074_v53 = vadd.f32 -1.0, %v1186_v51 }
 0x133   : > { %1187 = vpow2.f32 %v634_v52 }
 0x134   : > { %v559_v54 = vpop.f32.mrf.mxu1  ;;  %v679_v55 = vsel %vm599_vm2, %v554_v42, %v1074_v53 }
 0x135   : > { %v560_v56 = vadd.f32 %v1471_v36, %v559_v54  ;;  %732 = vmatmul.f32.gmra.mxu2 %v679_v55 }
 0x137   : > { %v617_v57 = vmin.f32 %v560_v56, 0.0  ;;  %vm601_vm4 = vcmp.gt.f32.partialorder %v560_v56, 0.0 }
 0x139   : > { %v1188_v58 = vpop.eup %1187  ;;  %v636_v59 = vmul.f32 1.442695, %v617_v57  ;;  %v889_v57 = vld [vmem:[%s1605_s5 + $0x78] sm:$0xff] }
 0x13a   : > { %v1075_v60 = vadd.f32 -1.0, %v1188_v58  ;;  %v888_v58 = vld [vmem:[%s1605_s5 + $0x70] sm:$0xff]  ;;  %894 = vmatpush.msra.mxu3 %v889_v57 }
 0x13b   : > { %1189 = vpow2.f32 %v636_v59 }
 0x13c   : > { %v562_v61 = vpop.f32.mrf.mxu1  ;;  %v680_v62 = vsel %vm600_vm3, %v557_v49, %v1075_v60  ;;  %895 = vmatpush.msra.mxu3 %v888_v58 }
 0x13d   : > { %v563_v63 = vadd.f32 %v1471_v36, %v562_v61  ;;  %735 = vmatmul.f32.gmra.mxu2 %v680_v62 }
 0x13f   : > { %v618_v0 = vmin.f32 %v563_v63, 0.0  ;;  %vm602_vm5 = vcmp.gt.f32.partialorder %v563_v63, 0.0 }
 0x141   : > { %v1190_v1 = vpop.eup %1189  ;;  %v638_v2 = vmul.f32 1.442695, %v618_v0 }
 0x142   : > { %v1076_v3 = vadd.f32 -1.0, %v1190_v1 }
 0x143   : > { %1191 = vpow2.f32 %v638_v2  ;;  %v887_v2 = vld [vmem:[%s1605_s5 + $0x68] sm:$0xff] }
 0x144   : > { %v565_v4 = vpop.f32.mrf.mxu1  ;;  %v681_v5 = vsel %vm601_vm4, %v560_v56, %v1076_v3  ;;  %v886_v3 = vld [vmem:[%s1605_s5 + $0x60] sm:$0xff]  ;;  %896 = vmatpush.msra.mxu3 %v887_v2 }
 0x145   : > { %v566_v6 = vadd.f32 %v1471_v36, %v565_v4  ;;  %738 = vmatmul.f32.gmra.mxu2 %v681_v5  ;;  %v885_v5 = vld [vmem:[%s1605_s5 + $0x58] sm:$0xff] }
 0x146   : > { %897 = vmatpush.msra.mxu3 %v886_v3 }
 0x147   : > { %v619_v7 = vmin.f32 %v566_v6, 0.0  ;;  %vm603_vm6 = vcmp.gt.f32.partialorder %v566_v6, 0.0 }
 0x148   : > { %898 = vmatpush.msra.mxu3 %v885_v5 }
 0x149   : > { %v1192_v8 = vpop.eup %1191  ;;  %v640_v9 = vmul.f32 1.442695, %v619_v7 }
 0x14a   : > { %v1077_v10 = vadd.f32 -1.0, %v1192_v8  ;;  %v884_v8 = vld [vmem:[%s1605_s5 + $0x50] sm:$0xff] }
 0x14b   : > { %1193 = vpow2.f32 %v640_v9  ;;  %899 = vmatpush.msra.mxu3 %v884_v8 }
 0x14c   : > { %v568_v11 = vpop.f32.mrf.mxu1  ;;  %v682_v12 = vsel %vm602_vm5, %v563_v63, %v1077_v10  ;;  %v883_v10 = vld [vmem:[%s1605_s5 + $0x48] sm:$0xff] }
 0x14d   : > { %v569_v13 = vadd.f32 %v1471_v36, %v568_v11  ;;  %741 = vmatmul.f32.gmra.mxu2 %v682_v12  ;;  %900 = vmatpush.msra.mxu3 %v883_v10 }
 0x14f   : > { %v620_v14 = vmin.f32 %v569_v13, 0.0  ;;  %vm604_vm7 = vcmp.gt.f32.partialorder %v569_v13, 0.0 }
 0x151   : > { %v1194_v15 = vpop.eup %1193  ;;  %v642_v16 = vmul.f32 1.442695, %v620_v14 }
 0x152   : > { %v1078_v17 = vadd.f32 -1.0, %v1194_v15  ;;  %v882_v15 = vld [vmem:[%s1605_s5 + $0x40] sm:$0xff] }
 0x153   : > { %1195 = vpow2.f32 %v642_v16  ;;  %901 = vmatpush.msra.mxu3 %v882_v15 }
 0x154   : > { %v571_v18 = vpop.f32.mrf.mxu1  ;;  %v683_v19 = vsel %vm603_vm6, %v566_v6, %v1078_v17 }
 0x155   : > { %v572_v20 = vadd.f32 %v1471_v36, %v571_v18  ;;  %744 = vmatmul.f32.gmra.mxu2 %v683_v19  ;;  %v881_v18 = vld [vmem:[%s1605_s5 + $0x38] sm:$0xff] }
 0x156   : > { %902 = vmatpush.msra.mxu3 %v881_v18 }
 0x157   : > { %v621_v21 = vmin.f32 %v572_v20, 0.0  ;;  %vm605_vm8 = vcmp.gt.f32.partialorder %v572_v20, 0.0 }
 0x159   : > { %v1196_v22 = vpop.eup %1195  ;;  %v644_v23 = vmul.f32 1.442695, %v621_v21 }
 0x15a   : > { %v1079_v24 = vadd.f32 -1.0, %v1196_v22 }
 0x15b   : > { %1197 = vpow2.f32 %v644_v23 }
 0x15c   : > { %v574_v25 = vpop.f32.mrf.mxu1  ;;  %v684_v26 = vsel %vm604_vm7, %v569_v13, %v1079_v24  ;;  %v879_v24 = vld [vmem:[%s1605_s5 + $0x28] sm:$0xff] }
 0x15d   : > { %v575_v27 = vadd.f32 %v1471_v36, %v574_v25  ;;  %747 = vmatmul.f32.gmra.mxu2 %v684_v26  ;;  %v878_v26 = vld [vmem:[%s1605_s5 + $0x20] sm:$0xff] }
 0x15f   : > { %v622_v28 = vmin.f32 %v575_v27, 0.0  ;;  %vm606_vm9 = vcmp.gt.f32.partialorder %v575_v27, 0.0 }
 0x161   : > { %v1198_v29 = vpop.eup %1197  ;;  %v646_v30 = vmul.f32 1.442695, %v622_v28 }
 0x162   : > { %v1080_v31 = vadd.f32 -1.0, %v1198_v29  ;;  %v877_v29 = vld [vmem:[%s1605_s5 + $0x18] sm:$0xff] }
 0x163   : > { %1199 = vpow2.f32 %v646_v30 }
 0x164   : > { %v577_v34 = vpop.f32.mrf.mxu1  ;;  %v685_v32 = vsel %vm605_vm8, %v572_v20, %v1080_v31  ;;  %v880_v20 = vld [vmem:[%s1605_s5 + $0x30] sm:$0xff] }
 0x165   : > { %v578_v33 = vadd.f32 %v1471_v36, %v577_v34  ;;  %750 = vmatmul.f32.gmra.mxu2 %v685_v32  ;;  %903 = vmatpush.msra.mxu3 %v880_v20  ;;  %v875_v34 = vld [vmem:[%s1605_s5 + $0x8] sm:$0xff]  ;;  %v874_v32 = vld [vmem:[%s1605_s5] sm:$0xff] }
 0x167   : > { %v623_v35 = vmin.f32 %v578_v33, 0.0  ;;  %vm607_vm10 = vcmp.gt.f32.partialorder %v578_v33, 0.0  ;;  %904 = vmatpush.msra.mxu3 %v879_v24 }
 0x169   : > { %v1200_v37 = vpop.eup %1199  ;;  %v648_v38 = vmul.f32 1.442695, %v623_v35  ;;  %905 = vmatpush.msra.mxu3 %v878_v26 }
 0x16a   : > { %v1081_v39 = vadd.f32 -1.0, %v1200_v37 }
 0x16b   : > { %1201 = vpow2.f32 %v648_v38  ;;  %906 = vmatpush.msra.mxu3 %v877_v29  ;;  %v1540_v38 = vld [vmem:[%s1604_s4 + $0x1] ss:$0 sm:$0xff] }
 0x16c   : > { %v580_v40 = vpop.f32.mrf.mxu1  ;;  %v686_v41 = vsel %vm606_vm9, %v575_v27, %v1081_v39 }
 0x16d   : > { %v581_v42 = vadd.f32 %v1471_v36, %v580_v40  ;;  %753 = vmatmul.f32.gmra.mxu2 %v686_v41 }
 0x16f   : > { %v624_v43 = vmin.f32 %v581_v42, 0.0  ;;  %vm608_vm11 = vcmp.gt.f32.partialorder %v581_v42, 0.0 }
 0x171   : > { %v1202_v44 = vpop.eup %1201  ;;  %v650_v45 = vmul.f32 1.442695, %v624_v43 }
 0x172   : > { %v1082_v46 = vadd.f32 -1.0, %v1202_v44 }
 0x173   : > { %1203 = vpow2.f32 %v650_v45 }
 0x174   : > { %v583_v47 = vpop.f32.mrf.mxu1  ;;  %v687_v48 = vsel %vm607_vm10, %v578_v33, %v1082_v46 }
 0x175   : > { %v584_v49 = vadd.f32 %v1471_v36, %v583_v47  ;;  %756 = vmatmul.f32.gmra.mxu2 %v687_v48 }
 0x177   : > { %v625_v50 = vmin.f32 %v584_v49, 0.0  ;;  %vm609_vm12 = vcmp.gt.f32.partialorder %v584_v49, 0.0 }
 0x179   : > { %v1204_v51 = vpop.eup %1203  ;;  %v652_v52 = vmul.f32 1.442695, %v625_v50 }
 0x17a   : > { %v1083_v53 = vadd.f32 -1.0, %v1204_v51 }
 0x17b   : > { %1205 = vpow2.f32 %v652_v52 }
 0x17c   : > { %v586_v54 = vpop.f32.mrf.mxu1  ;;  %v688_v55 = vsel %vm608_vm11, %v581_v42, %v1083_v53 }
 0x17d   : > { %v587_v56 = vadd.f32 %v1471_v36, %v586_v54  ;;  %759 = vmatmul.f32.gmra.mxu2 %v688_v55 }
 0x17f   : > { %v626_v59 = vmin.f32 %v587_v56, 0.0  ;;  %vm610_vm13 = vcmp.gt.f32.partialorder %v587_v56, 0.0 }
 0x181   : > { %v1206_v60 = vpop.eup %1205  ;;  %v654_v61 = vmul.f32 1.442695, %v626_v59 }
 0x182   : > { %v1084_v62 = vadd.f32 -1.0, %v1206_v60 }
 0x183   : > { %1207 = vpow2.f32 %v654_v61 }
 0x184   : > { %v589_v63 = vpop.f32.mrf.mxu1  ;;  %v689_v0 = vsel %vm609_vm12, %v584_v49, %v1084_v62 }
 0x185   : > { %v590_v1 = vadd.f32 %v1471_v36, %v589_v63  ;;  %762 = vmatmul.f32.gmra.mxu2 %v689_v0 }
 0x187   : > { %v627_v4 = vmin.f32 %v590_v1, 0.0  ;;  %vm611_vm14 = vcmp.gt.f32.partialorder %v590_v1, 0.0 }
 0x189   : > { %v1208_v6 = vpop.eup %1207  ;;  %v656_v7 = vmul.f32 1.442695, %v627_v4 }
 0x18a   : > { %v1085_v9 = vadd.f32 -1.0, %v1208_v6 }
 0x18b   : > { %1209 = vpow2.f32 %v656_v7 }
 0x18c   : > { %v592_v11 = vpop.f32.mrf.mxu1  ;;  %v690_v12 = vsel %vm610_vm13, %v587_v56, %v1085_v9 }
 0x18d   : > { %v593_v13 = vadd.f32 %v1471_v36, %v592_v11  ;;  %765 = vmatmul.f32.gmra.mxu2 %v690_v12 }
 0x18f   : > { %v628_v14 = vmin.f32 %v593_v13, 0.0  ;;  %vm612_vm15 = vcmp.gt.f32.partialorder %v593_v13, 0.0 }
 0x191   : > { %v1210_v16 = vpop.eup %1209  ;;  %v658_v17 = vmul.f32 1.442695, %v628_v14 }
 0x192   : > { %v1086_v19 = vadd.f32 -1.0, %v1210_v16 }
 0x193   : > { %1211 = vpow2.f32 %v658_v17 }
 0x194   : > { %v595_v21 = vpop.f32.mrf.mxu1  ;;  %v691_v22 = vsel %vm611_vm14, %v590_v1, %v1086_v19 }
 0x195   : > { %v596_v23 = vadd.f32 %v1471_v36, %v595_v21  ;;  %768 = vmatmul.f32.gmra.mxu2 %v691_v22  ;;  %v876_v36 = vld [vmem:[%s1605_s5 + $0x10] sm:$0xff] }
 0x196   : > { %907 = vmatpush.msra.mxu3 %v876_v36 }
 0x197   : > { %v629_v25 = vmin.f32 %v596_v23, 0.0  ;;  %vm613_vm0 = vcmp.gt.f32.partialorder %v596_v23, 0.0 }
 0x198   : > { %908 = vmatpush.msra.mxu3 %v875_v34 }
 0x199   : > { %v1212_v27 = vpop.eup %1211  ;;  %v660_v28 = vmul.f32 1.442695, %v629_v25 }
 0x19a   : > { %v1087_v30 = vadd.f32 -1.0, %v1212_v27  ;;  %909 = vmatpush.msra.mxu3 %v874_v32 }
 0x19b   : > { %1213 = vpow2.f32 %v660_v28 }
 0x19c   : > { %v692_v31 = vsel %vm612_vm15, %v593_v13, %v1087_v30 }
 0x19d   : > { %771 = vmatmul.f32.gmra.mxu2 %v692_v31 }
 0x1a1   : > { %v1214_v33 = vpop.eup %1213 }
 0x1a2   : > { %v1088_v35 = vadd.f32 -1.0, %v1214_v33 }
 0x1a4   : > { %v693_v37 = vsel %vm613_vm0, %v596_v23, %v1088_v35 }
 0x1a5   : > { %774 = vmatmul.f32.gmra.mxu2 %v693_v37 }
 0x1b0   : > { %v730_v39 = vpop.f32.mrf.mxu2 }
 0x1b1   : > { %v731_v40 = vadd.f32 %v1540_v38, %v730_v39 }
 0x1b3   : > { %v794_v41 = vmin.f32 %v731_v40, 0.0  ;;  %vm778_vm1 = vcmp.gt.f32.partialorder %v731_v40, 0.0 }
 0x1b5   : > { %v810_v42 = vmul.f32 1.442695, %v794_v41 }
 0x1b7   : > { %1215 = vpow2.f32 %v810_v42 }
 0x1b8   : > { %v733_v43 = vpop.f32.mrf.mxu2 }
 0x1b9   : > { %v734_v44 = vadd.f32 %v1540_v38, %v733_v43 }
 0x1bb   : > { %v795_v45 = vmin.f32 %v734_v44, 0.0  ;;  %vm779_vm2 = vcmp.gt.f32.partialorder %v734_v44, 0.0 }
 0x1bd   : > { %v1216_v46 = vpop.eup %1215  ;;  %v812_v47 = vmul.f32 1.442695, %v795_v45 }
 0x1be   : > { %v1105_v48 = vadd.f32 -1.0, %v1216_v46 }
 0x1bf   : > { %1217 = vpow2.f32 %v812_v47 }
 0x1c0   : > { %v736_v49 = vpop.f32.mrf.mxu2  ;;  %v858_v50 = vsel %vm778_vm1, %v731_v40, %v1105_v48  ;;  %vm959_vm1 = vcmask 7168  }
 0x1c1   : > { %v737_v51 = vadd.f32 %v1540_v38, %v736_v49  ;;  %910 = vmatmul.f32.vlgmr.msra.gmra.mxu3 %v858_v50 }
 0x1c3   : > { %v796_v52 = vmin.f32 %v737_v51, 0.0  ;;  %vm780_vm3 = vcmp.gt.f32.partialorder %v737_v51, 0.0 }
 0x1c5   : > { %v1218_v53 = vpop.eup %1217  ;;  %v814_v54 = vmul.f32 1.442695, %v796_v52 }
 0x1c6   : > { %v1106_v55 = vadd.f32 -1.0, %v1218_v53 }
 0x1c7   : > { %1219 = vpow2.f32 %v814_v54 }
 0x1c8   : > { %v739_v56 = vpop.f32.mrf.mxu2  ;;  %v859_v57 = vsel %vm779_vm2, %v734_v44, %v1106_v55 }
 0x1c9   : > { %v740_v58 = vadd.f32 %v1540_v38, %v739_v56  ;;  %913 = vmatmul.f32.gmra.mxu3 %v859_v57 }
 0x1cb   : > { %v797_v59 = vmin.f32 %v740_v58, 0.0  ;;  %vm781_vm4 = vcmp.gt.f32.partialorder %v740_v58, 0.0 }
 0x1cd   : > { %v1220_v60 = vpop.eup %1219  ;;  %v816_v61 = vmul.f32 1.442695, %v797_v59 }
 0x1ce   : > { %v1107_v62 = vadd.f32 -1.0, %v1220_v60 }
 0x1cf   : > { %1221 = vpow2.f32 %v816_v61 }
 0x1d0   : > { %v742_v63 = vpop.f32.mrf.mxu2  ;;  %v860_v0 = vsel %vm780_vm3, %v737_v51, %v1107_v62 }
 0x1d1   : > { %v743_v1 = vadd.f32 %v1540_v38, %v742_v63  ;;  %916 = vmatmul.f32.gmra.mxu3 %v860_v0 }
 0x1d3   : > { %v798_v2 = vmin.f32 %v743_v1, 0.0  ;;  %vm782_vm5 = vcmp.gt.f32.partialorder %v743_v1, 0.0 }
 0x1d5   : > { %v1222_v3 = vpop.eup %1221  ;;  %v818_v4 = vmul.f32 1.442695, %v798_v2 }
 0x1d6   : > { %v1108_v5 = vadd.f32 -1.0, %v1222_v3 }
 0x1d7   : > { %1223 = vpow2.f32 %v818_v4 }
 0x1d8   : > { %v745_v6 = vpop.f32.mrf.mxu2  ;;  %v861_v7 = vsel %vm781_vm4, %v740_v58, %v1108_v5 }
 0x1d9   : > { %v746_v8 = vadd.f32 %v1540_v38, %v745_v6  ;;  %919 = vmatmul.f32.gmra.mxu3 %v861_v7 }
 0x1db   : > { %v799_v9 = vmin.f32 %v746_v8, 0.0  ;;  %vm783_vm6 = vcmp.gt.f32.partialorder %v746_v8, 0.0 }
 0x1dd   : > { %v1224_v10 = vpop.eup %1223  ;;  %v820_v11 = vmul.f32 1.442695, %v799_v9 }
 0x1de   : > { %v1109_v12 = vadd.f32 -1.0, %v1224_v10 }
 0x1df   : > { %1225 = vpow2.f32 %v820_v11 }
 0x1e0   : > { %v748_v13 = vpop.f32.mrf.mxu2  ;;  %v862_v14 = vsel %vm782_vm5, %v743_v1, %v1109_v12 }
 0x1e1   : > { %v749_v15 = vadd.f32 %v1540_v38, %v748_v13  ;;  %922 = vmatmul.f32.gmra.mxu3 %v862_v14 }
 0x1e3   : > { %v800_v16 = vmin.f32 %v749_v15, 0.0  ;;  %vm784_vm7 = vcmp.gt.f32.partialorder %v749_v15, 0.0 }
 0x1e5   : > { %v1226_v17 = vpop.eup %1225  ;;  %v822_v18 = vmul.f32 1.442695, %v800_v16 }
 0x1e6   : > { %v1110_v19 = vadd.f32 -1.0, %v1226_v17 }
 0x1e7   : > { %1227 = vpow2.f32 %v822_v18 }
 0x1e8   : > { %v751_v20 = vpop.f32.mrf.mxu2  ;;  %v863_v21 = vsel %vm783_vm6, %v746_v8, %v1110_v19 }
 0x1e9   : > { %v752_v22 = vadd.f32 %v1540_v38, %v751_v20  ;;  %925 = vmatmul.f32.gmra.mxu3 %v863_v21 }
 0x1eb   : > { %v801_v23 = vmin.f32 %v752_v22, 0.0  ;;  %vm785_vm8 = vcmp.gt.f32.partialorder %v752_v22, 0.0 }
 0x1ed   : > { %v1228_v24 = vpop.eup %1227  ;;  %v824_v25 = vmul.f32 1.442695, %v801_v23 }
 0x1ee   : > { %v1111_v26 = vadd.f32 -1.0, %v1228_v24  ;;  %v1150_v24 = vld [vmem:[#allocation2] ss:$0 sm:$0xff] }
 0x1ef   : > { %1229 = vpow2.f32 %v824_v25 }
 0x1f0   : > { %v754_v27 = vpop.f32.mrf.mxu2  ;;  %v864_v28 = vsel %vm784_vm7, %v749_v15, %v1111_v26 }
 0x1f1   : > { %v755_v29 = vadd.f32 %v1540_v38, %v754_v27  ;;  %928 = vmatmul.f32.gmra.mxu3 %v864_v28 }
 0x1f3   : > { %v802_v30 = vmin.f32 %v755_v29, 0.0  ;;  %vm786_vm9 = vcmp.gt.f32.partialorder %v755_v29, 0.0 }
 0x1f5   : > { %v1230_v36 = vpop.eup %1229  ;;  %v826_v31 = vmul.f32 1.442695, %v802_v30 }
 0x1f6   : > { %v1112_v34 = vadd.f32 -1.0, %v1230_v36 }
 0x1f7   : > { %1231 = vpow2.f32 %v826_v31 }
 0x1f8   : > { %v757_v32 = vpop.f32.mrf.mxu2  ;;  %v865_v33 = vsel %vm785_vm8, %v752_v22, %v1112_v34 }
 0x1f9   : > { %v758_v35 = vadd.f32 %v1540_v38, %v757_v32  ;;  %931 = vmatmul.f32.gmra.mxu3 %v865_v33 }
 0x1fb   : > { %v803_v37 = vmin.f32 %v758_v35, 0.0  ;;  %vm787_vm10 = vcmp.gt.f32.partialorder %v758_v35, 0.0 }
 0x1fd   : > { %v1232_v39 = vpop.eup %1231  ;;  %v828_v40 = vmul.f32 1.442695, %v803_v37 }
 0x1fe   : > { %v1113_v41 = vadd.f32 -1.0, %v1232_v39 }
 0x1ff   : > { %1233 = vpow2.f32 %v828_v40 }
 0x200   : > { %v760_v42 = vpop.f32.mrf.mxu2  ;;  %v866_v43 = vsel %vm786_vm9, %v755_v29, %v1113_v41 }
 0x201   : > { %v761_v44 = vadd.f32 %v1540_v38, %v760_v42  ;;  %934 = vmatmul.f32.gmra.mxu3 %v866_v43 }
 0x203   : > { %v804_v45 = vmin.f32 %v761_v44, 0.0  ;;  %vm788_vm11 = vcmp.gt.f32.partialorder %v761_v44, 0.0 }
 0x205   : > { %v1234_v46 = vpop.eup %1233  ;;  %v830_v47 = vmul.f32 1.442695, %v804_v45 }
 0x206   : > { %v1114_v48 = vadd.f32 -1.0, %v1234_v46 }
 0x207   : > { %1235 = vpow2.f32 %v830_v47 }
 0x208   : > { %v763_v49 = vpop.f32.mrf.mxu2  ;;  %v867_v50 = vsel %vm787_vm10, %v758_v35, %v1114_v48 }
 0x209   : > { %v764_v51 = vadd.f32 %v1540_v38, %v763_v49  ;;  %937 = vmatmul.f32.gmra.mxu3 %v867_v50 }
 0x20b   : > { %v805_v52 = vmin.f32 %v764_v51, 0.0  ;;  %vm789_vm12 = vcmp.gt.f32.partialorder %v764_v51, 0.0 }
 0x20d   : > { %v1236_v53 = vpop.eup %1235  ;;  %v832_v54 = vmul.f32 1.442695, %v805_v52 }
 0x20e   : > { %v1115_v55 = vadd.f32 -1.0, %v1236_v53 }
 0x20f   : > { %1237 = vpow2.f32 %v832_v54 }
 0x210   : > { %v766_v56 = vpop.f32.mrf.mxu2  ;;  %v868_v57 = vsel %vm788_vm11, %v761_v44, %v1115_v55 }
 0x211   : > { %v767_v58 = vadd.f32 %v1540_v38, %v766_v56  ;;  %940 = vmatmul.f32.gmra.mxu3 %v868_v57 }
 0x213   : > { %v806_v59 = vmin.f32 %v767_v58, 0.0  ;;  %vm790_vm13 = vcmp.gt.f32.partialorder %v767_v58, 0.0 }
 0x215   : > { %v1238_v60 = vpop.eup %1237  ;;  %v834_v61 = vmul.f32 1.442695, %v806_v59 }
 0x216   : > { %v1116_v62 = vadd.f32 -1.0, %v1238_v60 }
 0x217   : > { %1239 = vpow2.f32 %v834_v61 }
 0x218   : > { %v769_v63 = vpop.f32.mrf.mxu2  ;;  %v869_v0 = vsel %vm789_vm12, %v764_v51, %v1116_v62 }
 0x219   : > { %v770_v1 = vadd.f32 %v1540_v38, %v769_v63  ;;  %943 = vmatmul.f32.gmra.mxu3 %v869_v0 }
 0x21b   : > { %v807_v2 = vmin.f32 %v770_v1, 0.0  ;;  %vm791_vm14 = vcmp.gt.f32.partialorder %v770_v1, 0.0 }
 0x21d   : > { %v1240_v3 = vpop.eup %1239  ;;  %v836_v4 = vmul.f32 1.442695, %v807_v2 }
 0x21e   : > { %v1117_v5 = vadd.f32 -1.0, %v1240_v3 }
 0x21f   : > { %1241 = vpow2.f32 %v836_v4 }
 0x220   : > { %v772_v6 = vpop.f32.mrf.mxu2  ;;  %v870_v7 = vsel %vm790_vm13, %v767_v58, %v1117_v5 }
 0x221   : > { %v773_v8 = vadd.f32 %v1540_v38, %v772_v6  ;;  %946 = vmatmul.f32.gmra.mxu3 %v870_v7 }
 0x223   : > { %v808_v9 = vmin.f32 %v773_v8, 0.0  ;;  %vm792_vm15 = vcmp.gt.f32.partialorder %v773_v8, 0.0 }
 0x225   : > { %v1242_v10 = vpop.eup %1241  ;;  %v838_v11 = vmul.f32 1.442695, %v808_v9 }
 0x226   : > { %v1118_v12 = vadd.f32 -1.0, %v1242_v10 }
 0x227   : > { %1243 = vpow2.f32 %v838_v11 }
 0x228   : > { %v775_v13 = vpop.f32.mrf.mxu2  ;;  %v871_v14 = vsel %vm791_vm14, %v770_v1, %v1118_v12 }
 0x229   : > { %v776_v15 = vadd.f32 %v1540_v38, %v775_v13  ;;  %949 = vmatmul.f32.gmra.mxu3 %v871_v14 }
 0x22b   : > { %v809_v16 = vmin.f32 %v776_v15, 0.0  ;;  %vm793_vm0 = vcmp.gt.f32.partialorder %v776_v15, 0.0 }
 0x22d   : > { %v1244_v17 = vpop.eup %1243  ;;  %v840_v18 = vmul.f32 1.442695, %v809_v16 }
 0x22e   : > { %v1119_v19 = vadd.f32 -1.0, %v1244_v17 }
 0x22f   : > { %1245 = vpow2.f32 %v840_v18 }
 0x230   : > { %v872_v20 = vsel %vm792_vm15, %v773_v8, %v1119_v19 }
 0x231   : > { %952 = vmatmul.f32.gmra.mxu3 %v872_v20 }
 0x235   : > { %v1246_v21 = vpop.eup %1245 }
 0x236   : > { %v1120_v22 = vadd.f32 -1.0, %v1246_v21 }
 0x238   : > { %v873_v23 = vsel %vm793_vm0, %v776_v15, %v1120_v22 }
 0x239   : > { %955 = vmatmul.f32.gmra.mxu3 %v873_v23 }
 0x244   : > { %v911_v38 = vpop.f32.mrf.mxu3 }
 0x245   : > { %v912_v25 = vadd.f32 %v1150_v24, %v911_v38 }
 0x247   : > { %960 = vst.msk [vmem:[%s1563_s9] sm:$0xff] %vm959_vm1, %v912_v25 }
 0x24c   : > { %v914_v26 = vpop.f32.mrf.mxu3 }
 0x24d   : > { %v915_v27 = vadd.f32 %v1150_v24, %v914_v26 }
 0x24f   : > { %961 = vst.msk [vmem:[%s1563_s9 + $0x8] sm:$0xff] %vm959_vm1, %v915_v27 }
 0x254   : > { %v917_v28 = vpop.f32.mrf.mxu3 }
 0x255   : > { %v918_v29 = vadd.f32 %v1150_v24, %v917_v28 }
 0x257   : > { %962 = vst.msk [vmem:[%s1563_s9 + $0x10] sm:$0xff] %vm959_vm1, %v918_v29 }
 0x25c   : > { %v920_v30 = vpop.f32.mrf.mxu3 }
 0x25d   : > { %v921_v36 = vadd.f32 %v1150_v24, %v920_v30 }
 0x25f   : > { %963 = vst.msk [vmem:[%s1563_s9 + $0x18] sm:$0xff] %vm959_vm1, %v921_v36 }
 0x264   : > { %v923_v31 = vpop.f32.mrf.mxu3 }
 0x265   : > { %v924_v34 = vadd.f32 %v1150_v24, %v923_v31 }
 0x267   : > { %964 = vst.msk [vmem:[%s1563_s9 + $0x20] sm:$0xff] %vm959_vm1, %v924_v34 }
 0x26c   : > { %v926_v32 = vpop.f32.mrf.mxu3 }
 0x26d   : > { %v927_v33 = vadd.f32 %v1150_v24, %v926_v32 }
 0x26f   : > { %965 = vst.msk [vmem:[%s1563_s9 + $0x28] sm:$0xff] %vm959_vm1, %v927_v33 }
 0x274   : > { %v929_v35 = vpop.f32.mrf.mxu3 }
 0x275   : > { %v930_v37 = vadd.f32 %v1150_v24, %v929_v35 }
 0x277   : > { %966 = vst.msk [vmem:[%s1563_s9 + $0x30] sm:$0xff] %vm959_vm1, %v930_v37 }
 0x27c   : > { %v932_v39 = vpop.f32.mrf.mxu3 }
 0x27d   : > { %v933_v40 = vadd.f32 %v1150_v24, %v932_v39 }
 0x27f   : > { %967 = vst.msk [vmem:[%s1563_s9 + $0x38] sm:$0xff] %vm959_vm1, %v933_v40 }
 0x284   : > { %v935_v41 = vpop.f32.mrf.mxu3 }
 0x285   : > { %v936_v42 = vadd.f32 %v1150_v24, %v935_v41 }
 0x287   : > { %968 = vst.msk [vmem:[%s1563_s9 + $0x40] sm:$0xff] %vm959_vm1, %v936_v42 }
 0x28c   : > { %v938_v43 = vpop.f32.mrf.mxu3 }
 0x28d   : > { %v939_v44 = vadd.f32 %v1150_v24, %v938_v43 }
 0x28f   : > { %969 = vst.msk [vmem:[%s1563_s9 + $0x48] sm:$0xff] %vm959_vm1, %v939_v44 }
 0x294   : > { %v941_v45 = vpop.f32.mrf.mxu3 }
 0x295   : > { %v942_v46 = vadd.f32 %v1150_v24, %v941_v45 }
 0x297   : > { %970 = vst.msk [vmem:[%s1563_s9 + $0x50] sm:$0xff] %vm959_vm1, %v942_v46 }
 0x29c   : > { %v944_v47 = vpop.f32.mrf.mxu3 }
 0x29d   : > { %v945_v48 = vadd.f32 %v1150_v24, %v944_v47 }
 0x29f   : > { %971 = vst.msk [vmem:[%s1563_s9 + $0x58] sm:$0xff] %vm959_vm1, %v945_v48 }
 0x2a4   : > { %v947_v49 = vpop.f32.mrf.mxu3 }
 0x2a5   : > { %v948_v50 = vadd.f32 %v1150_v24, %v947_v49 }
 0x2a7   : > { %972 = vst.msk [vmem:[%s1563_s9 + $0x60] sm:$0xff] %vm959_vm1, %v948_v50 }
 0x2ac   : > { %v950_v51 = vpop.f32.mrf.mxu3 }
 0x2ad   : > { %v951_v52 = vadd.f32 %v1150_v24, %v950_v51 }
 0x2af   : > { %973 = vst.msk [vmem:[%s1563_s9 + $0x68] sm:$0xff] %vm959_vm1, %v951_v52 }
 0x2b4   : > { %v953_v53 = vpop.f32.mrf.mxu3 }
 0x2b5   : > { %v954_v54 = vadd.f32 %v1150_v24, %v953_v53 }
 0x2b7   : > { %974 = vst.msk [vmem:[%s1563_s9 + $0x70] sm:$0xff] %vm959_vm1, %v954_v54 }
 0x2bc   : > { %v956_v55 = vpop.f32.mrf.mxu3 }
 0x2bd   : > { %v957_v56 = vadd.f32 %v1150_v24, %v956_v55 }
 0x2bf   : > { %975 = vst.msk [vmem:[%s1563_s9 + $0x78] sm:$0xff] %vm959_vm1, %v957_v56 }
 0x2c0 PF: > { %s19_s26 = sadd.s32 1, %s1253_s26  }
 0x2c1   : > { %p16_p4 = scmp.ge.s32.totalorder %s19_s26, 4  }
 0x2c3   :  { %18 = sbr.rel (!%p16_p4) target bundleno = 3 (0x3), region = 79 }

</bundles_post_ra>
